<compile_context>
chip_gen: v7x
topology: tpu7x:2x2x1
jax: 0.10.0
libtpu: 0.0.40
codegen_flags: <defaults>
</compile_context>

<pallas_src>
import functools

import numpy as np

import jax
import jax.numpy as jnp
from jax.experimental import pallas as pl
from jax.experimental.pallas import tpu as pltpu


# ---------------------------------------------------------------------------
# Kernels
# ---------------------------------------------------------------------------

def _sep_kernel(bh_ref, bw_ref, x_ref, o_ref, *, bn):
    """Separable Gaussian blur: out[b] = Bh @ (X[b] @ Bw), all on the MXU.

    bh_ref : (H, H) f32 vertical band matrix   (VMEM, constant block)
    bw_ref : (W, W) f32 horizontal band matrix (VMEM, constant block)
    x_ref  : (bn, H, W) input block  (native dtype)
    o_ref  : (bn, H, W) output block (native dtype)
    """
    bh = bh_ref[...]
    bw = bw_ref[...]

    def body(b, carry):
        xf = x_ref[b].astype(jnp.float32)                               # (H, W)
        tmp = jnp.dot(xf, bw, preferred_element_type=jnp.float32)       # horizontal
        out = jnp.dot(bh, tmp, preferred_element_type=jnp.float32)      # vertical
        o_ref[b] = out.astype(o_ref.dtype)
        return carry

    jax.lax.fori_loop(0, bn, body, 0, unroll=bn <= 8)


def _direct_kernel(sv_ref, bw_ref, x_ref, o_ref, *, bn, K):
    """General (non-separable) KxK kernel as K banded row-matmuls on the MXU.

    sv_ref : (K, H, H) f32 row-shift matrices (one per kernel row)
    bw_ref : (K, W, W) f32 per-row horizontal band matrices
    """
    def body(b, carry):
        xf = x_ref[b].astype(jnp.float32)                               # (H, W)
        acc = None
        for i in range(K):
            zi = jnp.dot(sv_ref[i], xf, preferred_element_type=jnp.float32)
            yi = jnp.dot(zi, bw_ref[i], preferred_element_type=jnp.float32)
            acc = yi if acc is None else acc + yi
        o_ref[b] = acc.astype(o_ref.dtype)
        return carry

    jax.lax.fori_loop(0, bn, body, 0, unroll=bn <= 4)


# ---------------------------------------------------------------------------
# Trace-time helpers (band-matrix construction, VMEM sizing)
# ---------------------------------------------------------------------------

def _band_np(n, taps, pad):
    """(n, n) Toeplitz band with B[r, c] = taps[r - c + pad] (0 outside band)."""
    K = taps.shape[0]
    d = np.arange(n)[:, None] - np.arange(n)[None, :] + pad
    ok = (d >= 0) & (d < K)
    return np.where(ok, taps[np.clip(d, 0, K - 1)], 0.0).astype(np.float32)


def _band_jnp(n, taps, pad):
    """Same as _band_np but for (possibly traced) jnp taps."""
    K = taps.shape[0]
    d = jnp.arange(n)[:, None] - jnp.arange(n)[None, :] + pad
    ok = (d >= 0) & (d < K)
    return jnp.where(ok, taps[jnp.clip(d, 0, K - 1)], 0.0).astype(jnp.float32)


def _shift_matrices_np(H, K, pad):
    """(K, H, H) matrices Sv_i with Sv_i[o, r] = 1 iff r == o + i - pad."""
    o = np.arange(H)[:, None]
    r = np.arange(H)[None, :]
    return np.stack([(r == o + (i - pad)).astype(np.float32) for i in range(K)], 0)


def _vmem_limit_bytes():
    """Generation-aware VMEM limit with headroom (64 MiB/core v7x, 128 MiB v5e/v6e)."""
    try:
        cap = int(pltpu.get_tpu_info().vmem_capacity_bytes)
    except Exception:
        cap = 64 << 20
    return int(min(cap * 3 // 4, 96 << 20))


def _pick_batch_block(N, per_image_bytes, fixed_bytes, budget_bytes, cap=128):
    avail = budget_bytes - fixed_bytes
    bn = min(int(N), cap, max(1, avail // max(per_image_bytes, 1)))
    return max(1, int(bn))


# ---------------------------------------------------------------------------
# Public wrapper
# ---------------------------------------------------------------------------

def gaussian_conv2d(x, sigma=1.0, trunc=2, kernel_weight=None):
    """Pallas equivalent of GaussianConv2d(sigma, trunc, kernel_weight)(x).

    x: (N, 1, H, W) array (NCHW). Returns (N, 1, H, W) in x.dtype.
    """
    N, C, H, W = x.shape
    assert C == 1, "GaussianConv2d uses a [1,1,K,K] kernel -> input must have 1 channel"

    width = int(round(trunc * sigma))
    K = 2 * width + 1
    pad = width

    t = np.arange(-width, width + 1, dtype=np.float32) / float(sigma)
    k1 = np.exp(-0.5 * t * t).astype(np.float32)

    separable = (kernel_weight is None) or (jnp.ndim(kernel_weight) == 0)

    limit = _vmem_limit_bytes()
    budget = int(limit * 0.6)
    isz = jnp.dtype(x.dtype).itemsize

    if separable:
        # A scalar kernel_weight cancels in the normalization, so the taps are
        # exactly the normalized 1-D Gaussian (compile-time numpy constants).
        taps = (k1 / k1.sum()).astype(np.float32)                # (K,)
        bh = jnp.asarray(_band_np(H, taps, pad).T)               # out = Bh @ tmp
        bw = jnp.asarray(_band_np(W, taps, pad))                 # tmp = X @ Bw
        operands = (bh, bw)
        mat_specs = [pl.BlockSpec((H, H), lambda n: (0, 0)),
                     pl.BlockSpec((W, W), lambda n: (0, 0))]
        fixed = 2 * (H * H + W * W) * 4
        body = functools.partial(_sep_kernel, bn=None)           # bn filled below
        make_body = lambda bn: functools.partial(_sep_kernel, bn=bn)
    else:
        # Non-separable: kernel2d = outer(k1, k1) * kernel_weight, normalized.
        k1j = jnp.asarray(k1)
        k2 = k1j[:, None] * k1j[None, :]
        k2 = k2 * jnp.asarray(kernel_weight, jnp.float32)
        k2 = (k2 / jnp.sum(k2)).astype(jnp.float32)              # (K, K)
        sv = jnp.asarray(_shift_matrices_np(H, K, pad))          # (K, H, H)
        bwr = jnp.stack([_band_jnp(W, k2[i], pad) for i in range(K)], 0)  # (K, W, W)
        operands = (sv, bwr)
        mat_specs = [pl.BlockSpec((K, H, H), lambda n: (0, 0, 0)),
                     pl.BlockSpec((K, W, W), lambda n: (0, 0, 0))]
        fixed = 2 * K * (H * H + W * W) * 4
        make_body = lambda bn: functools.partial(_direct_kernel, bn=bn, K=K)

    # Per-image VMEM: double-buffered in + out planes plus ~one image of f32
    # intermediates inside the fori_loop body.
    per_image = 4 * H * W * isz + 4 * H * W * 4
    bn = _pick_batch_block(N, per_image, fixed, budget)
    grid = (pl.cdiv(N, bn),)

    x3 = x.reshape(N, H, W)   # drop channel dim; layout-preserving

    out = pl.pallas_call(
        make_body(bn),
        out_shape=jax.ShapeDtypeStruct((N, H, W), x.dtype),
        grid_spec=pltpu.PrefetchScalarGridSpec(
            num_scalar_prefetch=0,
            grid=grid,
            in_specs=mat_specs + [pl.BlockSpec((bn, H, W), lambda n: (n, 0, 0))],
            out_specs=pl.BlockSpec((bn, H, W), lambda n: (n, 0, 0)),
        ),
        compiler_params=pltpu.CompilerParams(
            dimension_semantics=("parallel",),
            vmem_limit_bytes=limit,
        ),
    )(*operands, x3)

    return out.reshape(N, 1, H, W)


# ---------------------------------------------------------------------------
# Pure-JAX reference + self-test
# ---------------------------------------------------------------------------

def _reference_conv2d(x, sigma=1.0, trunc=2, kernel_weight=None):
    """Pure-JAX reference mirroring F.conv2d(x, kernel, padding=p)."""
    width = int(round(trunc * sigma))
    K = 2 * width + 1
    t = jnp.arange(-width, width + 1, dtype=jnp.float32) / sigma
    k1 = jnp.exp(-0.5 * t ** 2)
    k2 = k1[None, :] * k1[:, None]
    if kernel_weight is not None:
        k2 = k2 * jnp.asarray(kernel_weight, jnp.float32)
    k2 = k2 / jnp.sum(k2)
    w = k2.reshape(1, 1, K, K)
    return jax.lax.conv_general_dilated(
        x.astype(jnp.float32), w,
        window_strides=(1, 1),
        padding=((width, width), (width, width)),
        dimension_numbers=("NCHW", "OIHW", "NCHW"),
    ).astype(x.dtype)


if __name__ == "__main__":
    key = jax.random.PRNGKey(0)
    # NCHW with C=1 (required by the [1,1,5,5] Gaussian kernel).
    x = jax.random.normal(key, (2, 1, 16, 16), dtype=jnp.float32)

    # Tolerance note: the kernel runs its taps on the MXU (band matmuls) while
    # the reference uses XLA's conv; f32 matmul rounding may differ slightly.
    TOL = dict(atol=5e-3, rtol=5e-3)

    # Separable fast path (kernel_weight=None).
    y = jax.block_until_ready(gaussian_conv2d(x, sigma=1.0, trunc=2))
    y_ref = _reference_conv2d(x, sigma=1.0, trunc=2)
    assert y.shape == (2, 1, 16, 16)
    assert jnp.allclose(y, y_ref, **TOL), "separable path mismatch"

    # Scalar kernel_weight cancels in normalization -> same separable result.
    y_s = jax.block_until_ready(gaussian_conv2d(x, sigma=1.0, trunc=2, kernel_weight=3.0))
    assert jnp.allclose(y_s, y, atol=1e-6, rtol=1e-6), "scalar kernel_weight mismatch"

    # Non-separable array kernel_weight exercises the banded-row-matmul path.
    kw = 1.0 + 0.1 * jnp.arange(25, dtype=jnp.float32).reshape(5, 5)
    y2 = jax.block_until_ready(gaussian_conv2d(x, sigma=1.0, trunc=2, kernel_weight=kw))
    y2_ref = _reference_conv2d(x, sigma=1.0, trunc=2, kernel_weight=kw)
    assert jnp.allclose(y2, y2_ref, **TOL), "direct path mismatch"

    print("KERNEL_OK")
</pallas_src>

<mosaic_0001>
module attributes {stable_mosaic.version = 11 : i64} {
  func.func @_sep_kernel(%arg0: i32, %arg1: memref<16x16xf32, #tpu.memory_space<vmem>>, %arg2: memref<16x16xf32, #tpu.memory_space<vmem>>, %arg3: memref<2x16x16xf32, #tpu.memory_space<vmem>>, %arg4: memref<2x16x16xf32, #tpu.memory_space<vmem>>) attributes {dimension_semantics = [#tpu.dimension_semantics<parallel>], iteration_bounds = array<i64: 1>, scalar_prefetch = 0 : i64, scratch_operands = 0 : i64, tpu.core_type = #tpu.core_type<tc>, window_params = [{pipeline_mode = #tpu.pipeline_mode<synchronous>, transform_indices = @transform_0, window_bounds = array<i64: 16, 16>}, {pipeline_mode = #tpu.pipeline_mode<synchronous>, transform_indices = @transform_1, window_bounds = array<i64: 16, 16>}, {transform_indices = @transform_2, window_bounds = array<i64: 2, 16, 16>}, {transform_indices = @transform_3, window_bounds = array<i64: 2, 16, 16>}]} {
    %c0 = arith.constant 0 : index
    %c0_0 = arith.constant 0 : index
    %0 = vector.load %arg1[%c0, %c0_0] : memref<16x16xf32, #tpu.memory_space<vmem>>, vector<16x16xf32>
    %c0_1 = arith.constant 0 : index
    %c0_2 = arith.constant 0 : index
    %1 = vector.load %arg2[%c0_1, %c0_2] : memref<16x16xf32, #tpu.memory_space<vmem>>, vector<16x16xf32>
    %c0_i32 = arith.constant 0 : i32
    %2 = arith.index_cast %c0_i32 : i32 to index
    %c0_3 = arith.constant 0 : index
    %c0_4 = arith.constant 0 : index
    %3 = vector.load %arg3[%2, %c0_3, %c0_4] : memref<2x16x16xf32, #tpu.memory_space<vmem>>, vector<1x16x16xf32>
    %4 = vector.shape_cast %3 : vector<1x16x16xf32> to vector<16x16xf32>
    %cst = arith.constant dense<0.000000e+00> : vector<16x16xf32>
    %5 = tpu.matmul %4, %1, %cst {dimension_numbers = #tpu.dot_dimension_numbers<[1], [0], [0], [1], [0, 0, 1, 1], [], []>} : vector<16x16xf32>, vector<16x16xf32>, vector<16x16xf32> -> vector<16x16xf32>
    %cst_5 = arith.constant dense<0.000000e+00> : vector<16x16xf32>
    %6 = tpu.matmul %0, %5, %cst_5 {dimension_numbers = #tpu.dot_dimension_numbers<[1], [0], [0], [1], [0, 0, 1, 1], [], []>} : vector<16x16xf32>, vector<16x16xf32>, vector<16x16xf32> -> vector<16x16xf32>
    %7 = arith.index_cast %c0_i32 : i32 to index
    %c0_6 = arith.constant 0 : index
    %c0_7 = arith.constant 0 : index
    %8 = vector.load %arg4[%7, %c0_6, %c0_7] : memref<2x16x16xf32, #tpu.memory_space<vmem>>, vector<1x16x16xf32>
    %9 = vector.shape_cast %8 : vector<1x16x16xf32> to vector<16x16xf32>
    %10 = vector.shape_cast %6 : vector<16x16xf32> to vector<1x16x16xf32>
    tpu.vector_store %arg4[%7, %c0_6, %c0_7], %10 {strides = array<i32>} : memref<2x16x16xf32, #tpu.memory_space<vmem>>, vector<1x16x16xf32>,
    %c1_i32 = arith.constant 1 : i32
    %11 = arith.index_cast %c1_i32 : i32 to index
    %c0_8 = arith.constant 0 : index
    %c0_9 = arith.constant 0 : index
    %12 = vector.load %arg3[%11, %c0_8, %c0_9] : memref<2x16x16xf32, #tpu.memory_space<vmem>>, vector<1x16x16xf32>
    %13 = vector.shape_cast %12 : vector<1x16x16xf32> to vector<16x16xf32>
    %cst_10 = arith.constant dense<0.000000e+00> : vector<16x16xf32>
    %14 = tpu.matmul %13, %1, %cst_10 {dimension_numbers = #tpu.dot_dimension_numbers<[1], [0], [0], [1], [0, 0, 1, 1], [], []>} : vector<16x16xf32>, vector<16x16xf32>, vector<16x16xf32> -> vector<16x16xf32>
    %cst_11 = arith.constant dense<0.000000e+00> : vector<16x16xf32>
    %15 = tpu.matmul %0, %14, %cst_11 {dimension_numbers = #tpu.dot_dimension_numbers<[1], [0], [0], [1], [0, 0, 1, 1], [], []>} : vector<16x16xf32>, vector<16x16xf32>, vector<16x16xf32> -> vector<16x16xf32>
    %16 = arith.index_cast %c1_i32 : i32 to index
    %c0_12 = arith.constant 0 : index
    %c0_13 = arith.constant 0 : index
    %17 = vector.load %arg4[%16, %c0_12, %c0_13] : memref<2x16x16xf32, #tpu.memory_space<vmem>>, vector<1x16x16xf32>
    %18 = vector.shape_cast %17 : vector<1x16x16xf32> to vector<16x16xf32>
    %19 = vector.shape_cast %15 : vector<16x16xf32> to vector<1x16x16xf32>
    tpu.vector_store %arg4[%16, %c0_12, %c0_13], %19 {strides = array<i32>} : memref<2x16x16xf32, #tpu.memory_space<vmem>>, vector<1x16x16xf32>,
    %c2_i32 = arith.constant 2 : i32
    return
  }
  func.func @transform_0(%arg0: i32) -> (i32, i32) {
    %c0_i32 = arith.constant 0 : i32
    %c0_i32_0 = arith.constant 0 : i32
    %c0_i32_1 = arith.constant 0 : i32
    return %c0_i32, %c0_i32_0 : i32, i32
  }
  func.func @transform_1(%arg0: i32) -> (i32, i32) {
    %c0_i32 = arith.constant 0 : i32
    %c0_i32_0 = arith.constant 0 : i32
    %c0_i32_1 = arith.constant 0 : i32
    return %c0_i32, %c0_i32_0 : i32, i32
  }
  func.func @transform_2(%arg0: i32) -> (i32, i32, i32) {
    %c0_i32 = arith.constant 0 : i32
    %c0_i32_0 = arith.constant 0 : i32
    %c0_i32_1 = arith.constant 0 : i32
    return %arg0, %c0_i32, %c0_i32_0 : i32, i32, i32
  }
  func.func @transform_3(%arg0: i32) -> (i32, i32, i32) {
    %c0_i32 = arith.constant 0 : i32
    %c0_i32_0 = arith.constant 0 : i32
    %c0_i32_1 = arith.constant 0 : i32
    return %arg0, %c0_i32, %c0_i32_0 : i32, i32, i32
  }
}

</mosaic_0001>

<bundles_post_ra>
// kernel: tpu_custom_call.1
= control target key start
LH: loop header
LB: loop body
LE: loop exit
PB: predicated region body
PF: predicated region fallthrough
CT: control target
= control target key end

     0   :  { %8 = vsyncpa [#allocation3], 0  ;;  %s680_s0 = inlined_call_operand.hbm [shape: f32[16,16], index: 0, kind: input, shape index: {}]   ;;  %s681_s1 = inlined_call_operand.hbm [shape: f32[16,16], index: 1, kind: input, shape index: {}]   ;;  %s682_s2 = inlined_call_operand.hbm [shape: f32[2,16,16], index: 2, kind: input, shape index: {}]   ;;  %s683_s3 = inlined_call_operand.hbm [shape: f32[2,16,16], index: 3, kind: output, shape index: {}]  }
   0x1   :  { %9 = vsyncpa [#allocation6], 0 }
   0x2   :  { %10 = vsyncpa [#allocation4], 0  ;;  %s575_s12 = smov [#allocation5]   ;;  %s576_s14 = smov [#allocation2]  }
   0x3   :  { %s28_s13 = sshll.u32 %s575_s12, 4  ;;  %s16_s15 = sshll.u32 %s576_s14, 4  ;;  %s29_s13 = int_to_ptr.vmem [resolvable:$true] %s28_s13  ;;  %s601_s15 = int_to_ptr.vmem [resolvable:$true] %s16_s15 }
   0x4   :  { %s481_s18 = scalar_lea.hbm %s681_s1, 256 }
   0x5   :  { %p482_p0 = scmp.ne.s32.totalorder %s681_s1, %s481_s18  ;;  %p485_p1 = scmp.lt.u32.totalorder %s481_s18, %s681_s1 }
   0x7   :  { %p487_p2 = pnand %p485_p1, %p482_p0 }
   0x9   :  { %490 = shalt.err (!%p487_p2)
}
   0xa   :  { %s491_s23 = scalar_lea.vmem %s29_s13, 256  ;;  %p496_p4 = scmp.lt.s32.totalorder %s29_s13, %s29_s13 }
   0xb   :  { %p492_p3 = scmp.ne.s32.totalorder %s29_s13, %s491_s23  ;;  %p497_p5 = scmp.lt.s32.totalorder %s491_s23, %s491_s23 }
   0xd   :  { %p498_p6 = por %p497_p5, %p496_p4 }
   0xf   :  { %p499_p7 = pnand %p498_p6, %p492_p3 }
  0x11   :  { %502 = shalt.err (!%p499_p7)
}
  0x12   :  { %s577_s24 = smov 128   ;;  %s578_s25 = smov 8  }
  0x13   :  { %34 = dma.hbm_to_vmem [thread:$0]  %s681_s1, 256, %s29_s13, [#allocation6], %s577_s24, %s577_s24, %s578_s25  }
  0x14   :  { %s503_s30 = scalar_lea.hbm %s680_s0, 256 }
  0x15   :  { %p504_p8 = scmp.ne.s32.totalorder %s680_s0, %s503_s30  ;;  %p507_p9 = scmp.lt.u32.totalorder %s503_s30, %s680_s0 }
  0x17   :  { %p509_p10 = pnand %p507_p9, %p504_p8 }
  0x19   :  { %512 = shalt.err (!%p509_p10)
}
  0x1a   :  { %s513_s8 = scalar_lea.vmem %s601_s15, 256  ;;  %p518_p12 = scmp.lt.s32.totalorder %s601_s15, %s601_s15 }
  0x1b   :  { %p514_p11 = scmp.ne.s32.totalorder %s601_s15, %s513_s8  ;;  %p519_p13 = scmp.lt.s32.totalorder %s513_s8, %s513_s8 }
  0x1d   :  { %p520_p0 = por %p519_p13, %p518_p12 }
  0x1f   :  { %p521_p1 = pnand %p520_p0, %p514_p11 }
  0x21   :  { %524 = shalt.err (!%p521_p1)
}
  0x22   :  { %22 = dma.hbm_to_vmem [thread:$0]  %s680_s0, 256, %s601_s15, [#allocation3], %s577_s24, %s577_s24, %s578_s25  }
  0x23   :  { %s579_s10 = smov [#allocation7]   ;;  %s525_s14 = scalar_lea.hbm %s682_s2, 512 }
  0x24   :  { %s40_s11 = sshll.u32 %s579_s10, 4  ;;  %p526_p2 = scmp.ne.s32.totalorder %s682_s2, %s525_s14  ;;  %s41_s11 = int_to_ptr.vmem [resolvable:$true] %s40_s11 }
  0x25   :  { %p529_p3 = scmp.lt.u32.totalorder %s525_s14, %s682_s2 }
  0x27   :  { %p531_p4 = pnand %p529_p3, %p526_p2 }
  0x29   :  { %534 = shalt.err (!%p531_p4)
}
  0x2a   :  { %s535_s20 = scalar_lea.vmem %s41_s11, 512  ;;  %p540_p6 = scmp.lt.s32.totalorder %s41_s11, %s41_s11 }
  0x2b   :  { %p536_p5 = scmp.ne.s32.totalorder %s41_s11, %s535_s20  ;;  %p541_p7 = scmp.lt.s32.totalorder %s535_s20, %s535_s20 }
  0x2d   :  { %p542_p8 = por %p541_p7, %p540_p6 }
  0x2f   :  { %p543_p9 = pnand %p542_p8, %p536_p5 }
  0x31   :  { %546 = shalt.err (!%p543_p9)
}
  0x32   :  { %46 = dma.hbm_to_vmem [thread:$0]  %s682_s2, 512, %s41_s11, [#allocation6], %s577_s24, %s577_s24, %s578_s25  }
  0x33   :  { %569 = dma.done.wait [#allocation3], 256  }
  0x34   :  { %570 = vsyncadd [#allocation3], 4294967040 }
  0x35   :  { %571 = dma.done.wait [#allocation6], 768  }
  0x36   :  { %572 = vsyncadd [#allocation6], 4294966528  ;;  %vm62_vm0 = vcmask 130048   ;;  %v58_v0 = vld [vmem:[#allocation5] sm:$0xff]  ;;  %v59_v1 = vld [vmem:[#allocation5 + $0x8] sm:$0xff]  ;;  %s580_s2 = smov [#allocation8]  }
  0x37   :  { %v60_v2 = vld [vmem:[#allocation7] sm:$0xff]  ;;  %v459_v3 = vpack.c.bf16 %v59_v1, %v58_v0  ;;  %v61_v4 = vld [vmem:[#allocation7 + $0x8] sm:$0xff]  ;;  %v228_v5 = vld [vmem:[#allocation7 + $0x10] sm:$0xff]  ;;  %s394_s21 = sshll.u32 %s580_s2, 4  ;;  %s395_s21 = int_to_ptr.vmem [resolvable:$true] %s394_s21 }
  0x38   :  { %435 = vmatprep.mubr.msk.f32.mxu0 %vm62_vm0, %v60_v2  ;;  %v229_v6 = vld [vmem:[#allocation7 + $0x18] sm:$0xff]  ;;  %v56_v7 = vld [vmem:[#allocation2] sm:$0xff]  ;;  %v57_v13 = vld [vmem:[#allocation2 + $0x8] sm:$0xff]  ;;  %s547_s22 = scalar_lea.vmem %s395_s21, 512  ;;  %p552_p11 = scmp.lt.s32.totalorder %s395_s21, %s395_s21 }
  0x39   :  { %460 = vmatprep.subr.bf16.mxu0 %v459_v3  ;;  %442 = vmatprep.mubr.msk.f32.mxu1 %vm62_vm0, %v56_v7  ;;  %p548_p10 = scmp.ne.s32.totalorder %s395_s21, %s547_s22  ;;  %p553_p12 = scmp.lt.s32.totalorder %s547_s22, %s547_s22 }
  0x3a   :  { %462 = vmatpush3.bf16.msra.mxu0 %v459_v3 }
  0x3b   :  { %468 = vmatprep.subr.bf16.mxu0 %v459_v3  ;;  %p554_p13 = por %p553_p12, %p552_p11 }
  0x3d   :  { %436 = vmatmul.mubr.msk.f32.vlgmr.msra.gmra.mrb[0].mxu0 %vm62_vm0, %v61_v4  ;;  %p555_p0 = pnand %p554_p13, %p548_p10 }
  0x3e   :  { %470 = vmatpush3.bf16.msra.mxu0 %v459_v3  ;;  %449 = vmatprep.mubr.msk.f32.mxu0 %vm62_vm0, %v228_v5 }
  0x41   :  { %450 = vmatmul.mubr.msk.f32.vlgmr.msra.gmra.mrb[2].mxu0 %vm62_vm0, %v229_v6 }
 0x110   :  { %v437_v8 = vpop.f32.mrb[0].mxu0 }
 0x111   :  { %v135_v9 = vpop.f32.mrb[1].mxu0 }
 0x112   :  { %v463_v10 = vpack.c.bf16 %v437_v8, %v135_v9 }
 0x114   :  { %464 = vmatprep.subr.bf16.mxu1 %v463_v10  ;;  %v451_v11 = vpop.f32.mrb[2].mxu0 }
 0x115   :  { %466 = vmatpush3.bf16.msra.mxu1 %v463_v10  ;;  %v302_v12 = vpop.f32.mrb[3].mxu0 }
 0x116   :  { %v471_v14 = vpack.c.bf16 %v451_v11, %v302_v12 }
 0x118   :  { %443 = vmatmul.mubr.msk.f32.vlgmr.msra.gmra.mrb[0].mxu1 %vm62_vm0, %v57_v13  ;;  %472 = vmatprep.subr.bf16.mxu1 %v471_v14 }
 0x119   :  { %474 = vmatpush3.bf16.msra.mxu1 %v471_v14  ;;  %456 = vmatprep.mubr.msk.f32.mxu1 %vm62_vm0, %v56_v7 }
 0x11c   :  { %457 = vmatmul.mubr.msk.f32.vlgmr.msra.gmra.mrb[2].mxu1 %vm62_vm0, %v57_v13 }
 0x1eb   :  { %v444_v15 = vpop.f32.mrb[0].mxu1 }
 0x1ec   :  { %226 = vst.msk [vmem:[#allocation8 + $0x8] sm:$0xff] %vm62_vm0, %v444_v15  ;;  %v216_v16 = vpop.f32.mrb[1].mxu1 }
 0x1ed   :  { %225 = vst.msk [vmem:[#allocation8] sm:$0xff] %vm62_vm0, %v216_v16 }
 0x1ef   :  { %v458_v17 = vpop.f32.mrb[2].mxu1 }
 0x1f0   :  { %388 = vst.msk [vmem:[#allocation8 + $0x18] sm:$0xff] %vm62_vm0, %v458_v17  ;;  %v377_v18 = vpop.f32.mrb[3].mxu1 }
 0x1f1   :  { %387 = vst.msk [vmem:[#allocation8 + $0x10] sm:$0xff] %vm62_vm0, %v377_v18 }
 0x1f2   :  { %558 = shalt.err (!%p555_p0)
}
 0x1f3   :  { %s559_s27 = scalar_lea.hbm %s683_s3, 512 }
 0x1f4   :  { %p560_p1 = scmp.ne.s32.totalorder %s683_s3, %s559_s27  ;;  %p563_p2 = scmp.lt.u32.totalorder %s559_s27, %s683_s3 }
 0x1f6   :  { %p565_p3 = pnand %p563_p2, %p560_p1 }
 0x1f8   :  { %568 = shalt.err (!%p565_p3)
}
 0x1f9   :  { %400 = dma.vmem_to_hbm [thread:$0]  %s395_s21, 512, %s683_s3, [#allocation4], %s577_s24, %s577_s24, %s578_s25  }
 0x1fa   :  { %573 = dma.done.wait [#allocation4], 512  }
 0x1fb   :  { %574 = vsyncadd [#allocation4], 4294966784 }
 0x1fc   :  { %404 = vsyncpa [#allocation3], 1 }
 0x1fd   :  { %405 = vsyncpa [#allocation6], 1 }
 0x1fe   :  { %406 = vsyncpa [#allocation4], 1 }

</bundles_post_ra>
